<compile_context>
chip_gen: v5e
topology: v5e:2x2
jax: 0.10.0
libtpu: 0.0.40
codegen_flags: <defaults>
</compile_context>

<pallas_src>
import jax
import jax.numpy as jnp
from jax.experimental import pallas as pl
from jax.experimental.pallas import tpu as pltpu

_EPSILON = 1e-16
_LANE = 128
_SUBLANE = 8
# Below this many elements a fused XLA elementwise op beats the fixed Pallas
# dispatch / per-step overhead, so we skip pallas_call entirely.
_PALLAS_MIN_ELEMENTS = 16 * 1024
# Total VMEM budget for the streamed (double-buffered) blocks; conservative
# enough for v5e's 16 MiB scoped default and v7x's 64 MiB physical VMEM.
_STREAM_VMEM_BUDGET = 16 * 1024 * 1024
_MAX_TILE_ROWS = 1024
_VMEM_LIMIT_BYTES = 64 * 1024 * 1024


# ---------------------------------------------------------------------------
# Kernels
# ---------------------------------------------------------------------------
def _normalize_kernel(x_ref, off_ref, inv_scale_ref, o_ref):
    # (TB, F) - (1, F) broadcast, then multiply by precomputed 1/scale.
    o_ref[...] = (x_ref[...] - off_ref[...]) * inv_scale_ref[...]


def _unnormalize_kernel(loc_ref, sig_ref, off_ref, scale_ref, mu_ref, osig_ref):
    # mu    = loc   * scale + offset
    # sigma = sigma * scale
    s = scale_ref[...]
    mu_ref[...] = loc_ref[...] * s + off_ref[...]
    osig_ref[...] = sig_ref[...] * s


# ---------------------------------------------------------------------------
# Helpers
# ---------------------------------------------------------------------------
def _round_up(x, m):
    return ((x + m - 1) // m) * m


def _pad_feature(x, f_pad, fill=0.0):
    """Pad the last (feature) dim of a 2-D array up to f_pad lanes."""
    pad = f_pad - x.shape[-1]
    if pad == 0:
        return x
    return jnp.concatenate(
        [x, jnp.full(x.shape[:-1] + (pad,), fill, x.dtype)], axis=-1
    )


# ---------------------------------------------------------------------------
# Module-equivalent wrapper
# ---------------------------------------------------------------------------
class NormalizerNormal:
    """JAX/Pallas port of NormalizerNormal. Buffers stored as (1, F) f32."""

    def __init__(self, offset, scale, *, max_tile_rows=None):
        offset = jnp.asarray(offset, dtype=jnp.float32).reshape(1, -1)
        scale = jnp.asarray(scale, dtype=jnp.float32).reshape(1, -1) + _EPSILON
        self.offset = offset
        self.scale = scale
        self.inv_scale = 1.0 / scale  # exact f32 reciprocal, computed once

        self._F = offset.shape[-1]
        self._F_pad = _round_up(self._F, _LANE)
        self._max_tile_rows = max_tile_rows

        # Lane-dense (padded) parameter slabs; padding uses identity values
        # (offset 0, scale 1) so padded lanes never produce inf/nan.
        self._offset_p = _pad_feature(self.offset, self._F_pad, 0.0)
        self._scale_p = _pad_feature(self.scale, self._F_pad, 1.0)
        self._inv_scale_p = _pad_feature(self.inv_scale, self._F_pad, 1.0)

    # -- tiling ------------------------------------------------------------
    def _tile_rows(self, batch, n_streams):
        # n_streams = number of (TB, F_pad) f32 arrays streamed through HBM
        # (inputs + outputs); each is double-buffered by the Pallas pipeline.
        per_block = _STREAM_VMEM_BUDGET // (2 * n_streams)
        tb = per_block // (self._F_pad * 4)
        tb = max(_SUBLANE, min(_MAX_TILE_ROWS, (tb // _SUBLANE) * _SUBLANE))
        if self._max_tile_rows is not None:
            cap = max(_SUBLANE, (self._max_tile_rows // _SUBLANE) * _SUBLANE)
            tb = min(tb, cap)
        if batch <= tb:
            return batch  # single block spanning the full batch dim (legal)
        return tb

    def _compiler_params(self):
        return pltpu.CompilerParams(
            dimension_semantics=("parallel",),
            vmem_limit_bytes=_VMEM_LIMIT_BYTES,
        )

    # -- ops ---------------------------------------------------------------
    def normalize(self, data):
        data = jnp.asarray(data, dtype=jnp.float32)
        squeeze = data.ndim == 1
        if squeeze:
            data = data[None, :]
        B, F = data.shape
        assert F == self._F, "feature dim mismatch with offset/scale buffers"

        if data.size < _PALLAS_MIN_ELEMENTS:
            # Tiny tensors: let XLA fuse the elementwise math.
            out = (data - self.offset) * self.inv_scale
            return out[0] if squeeze else out

        f_pad = self._F_pad
        x = _pad_feature(data, f_pad)
        tb = self._tile_rows(B, n_streams=2)  # 1 streamed input + 1 output
        grid = (pl.cdiv(B, tb),)
        data_spec = pl.BlockSpec((tb, f_pad), lambda i: (i, 0))
        param_spec = pl.BlockSpec((1, f_pad), lambda i: (0, 0))

        out = pl.pallas_call(
            _normalize_kernel,
            out_shape=jax.ShapeDtypeStruct((B, f_pad), jnp.float32),
            grid=grid,
            in_specs=[data_spec, param_spec, param_spec],
            out_specs=data_spec,
            compiler_params=self._compiler_params(),
            cost_estimate=pl.CostEstimate(
                flops=2 * B * f_pad,
                transcendentals=0,
                bytes_accessed=(2 * B * f_pad + 2 * f_pad) * 4,
            ),
        )(x, self._offset_p, self._inv_scale_p)

        if f_pad != F:
            out = out[:, :F]
        return out[0] if squeeze else out

    def unnormalize(self, loc, sigma):
        """Takes the Normal distribution params (loc, scale); returns the
        unnormalized params (mu, sigma)."""
        loc = jnp.asarray(loc, dtype=jnp.float32)
        sigma = jnp.asarray(sigma, dtype=jnp.float32)
        assert loc.shape == sigma.shape
        squeeze = loc.ndim == 1
        if squeeze:
            loc, sigma = loc[None, :], sigma[None, :]
        B, F = loc.shape
        assert F == self._F, "feature dim mismatch with offset/scale buffers"

        if loc.size < _PALLAS_MIN_ELEMENTS:
            mu = loc * self.scale + self.offset
            new_sig = sigma * self.scale
            if squeeze:
                mu, new_sig = mu[0], new_sig[0]
            return mu, new_sig

        f_pad = self._F_pad
        loc_p = _pad_feature(loc, f_pad)
        sig_p = _pad_feature(sigma, f_pad)
        tb = self._tile_rows(B, n_streams=4)  # 2 streamed inputs + 2 outputs
        grid = (pl.cdiv(B, tb),)
        data_spec = pl.BlockSpec((tb, f_pad), lambda i: (i, 0))
        param_spec = pl.BlockSpec((1, f_pad), lambda i: (0, 0))

        mu, new_sig = pl.pallas_call(
            _unnormalize_kernel,
            out_shape=(
                jax.ShapeDtypeStruct((B, f_pad), jnp.float32),
                jax.ShapeDtypeStruct((B, f_pad), jnp.float32),
            ),
            grid=grid,
            in_specs=[data_spec, data_spec, param_spec, param_spec],
            out_specs=(data_spec, data_spec),
            compiler_params=self._compiler_params(),
            cost_estimate=pl.CostEstimate(
                flops=3 * B * f_pad,
                transcendentals=0,
                bytes_accessed=(4 * B * f_pad + 2 * f_pad) * 4,
            ),
        )(loc_p, sig_p, self._offset_p, self._scale_p)

        if f_pad != F:
            mu, new_sig = mu[:, :F], new_sig[:, :F]
        if squeeze:
            mu, new_sig = mu[0], new_sig[0]
        # TODO(synk): no tdist.Normal equivalent in JAX core; returning (mu, sigma).
        return mu, new_sig

    def forward(self, *args):
        raise Exception("Don't run with forward")


# ---------------------------------------------------------------------------
# Demo / self-check
# ---------------------------------------------------------------------------
if __name__ == "__main__":
    key = jax.random.PRNGKey(0)
    ks = jax.random.split(key, 10)

    # --- case 1: unaligned F (padding path) + multi-step ragged batch grid ---
    B, F = 300, 100
    offset = jax.random.normal(ks[0], (F,), dtype=jnp.float32)
    scale = jax.random.uniform(ks[1], (F,), dtype=jnp.float32, minval=0.5, maxval=2.0)
    norm = NormalizerNormal(offset, scale, max_tile_rows=128)  # forces 3 grid steps

    data = jax.random.normal(ks[2], (B, F), dtype=jnp.float32)
    loc = jax.random.normal(ks[3], (B, F), dtype=jnp.float32)
    sig = jax.random.uniform(ks[4], (B, F), dtype=jnp.float32, minval=0.1, maxval=1.0)

    out_norm = jax.block_until_ready(norm.normalize(data))
    ref_norm = (data - norm.offset) / norm.scale
    assert jnp.allclose(out_norm, ref_norm, rtol=1e-5, atol=1e-6)

    mu, new_sig = norm.unnormalize(loc, sig)
    jax.block_until_ready((mu, new_sig))
    assert jnp.allclose(mu, loc * norm.scale + norm.offset, rtol=1e-6, atol=1e-6)
    assert jnp.allclose(new_sig, sig * norm.scale, rtol=1e-6, atol=1e-6)

    # --- case 2: lane/sublane-aligned shapes, default (auto) tiling ---------
    B2, F2 = 512, 128
    offset2 = jax.random.normal(ks[5], (F2,), dtype=jnp.float32)
    scale2 = jax.random.uniform(ks[6], (F2,), dtype=jnp.float32, minval=0.5, maxval=2.0)
    norm2 = NormalizerNormal(offset2, scale2)

    data2 = jax.random.normal(ks[7], (B2, F2), dtype=jnp.float32)
    out2 = jax.block_until_ready(norm2.normalize(data2))
    ref2 = (data2 - norm2.offset) / norm2.scale
    assert jnp.allclose(out2, ref2, rtol=1e-5, atol=1e-6)

    # --- case 3: tiny input exercises the fused-XLA fallback path -----------
    tiny = jax.random.normal(ks[8], (4, F), dtype=jnp.float32)
    out_tiny = jax.block_until_ready(norm.normalize(tiny))
    assert jnp.allclose(out_tiny, (tiny - norm.offset) / norm.scale,
                        rtol=1e-5, atol=1e-6)

    print("KERNEL_OK")
</pallas_src>

<mosaic_0001>
module attributes {stable_mosaic.version = 11 : i64} {
  func.func @_normalize_kernel(%arg0: i32, %arg1: memref<128x128xf32, #tpu.memory_space<vmem>>, %arg2: memref<1x128xf32, #tpu.memory_space<vmem>>, %arg3: memref<1x128xf32, #tpu.memory_space<vmem>>, %arg4: memref<128x128xf32, #tpu.memory_space<vmem>>) attributes {dimension_semantics = [#tpu.dimension_semantics<parallel>], iteration_bounds = array<i64: 3>, scalar_prefetch = 0 : i64, scratch_operands = 0 : i64, tpu.core_type = #tpu.core_type<tc>, window_params = [{transform_indices = @transform_0, window_bounds = array<i64: 128, 128>}, {pipeline_mode = #tpu.pipeline_mode<synchronous>, transform_indices = @transform_1, window_bounds = array<i64: 1, 128>}, {pipeline_mode = #tpu.pipeline_mode<synchronous>, transform_indices = @transform_2, window_bounds = array<i64: 1, 128>}, {transform_indices = @transform_3, window_bounds = array<i64: 128, 128>}]} {
    %c0 = arith.constant 0 : index
    %c0_0 = arith.constant 0 : index
    %0 = vector.load %arg1[%c0, %c0_0] : memref<128x128xf32, #tpu.memory_space<vmem>>, vector<128x128xf32>
    %c0_1 = arith.constant 0 : index
    %c0_2 = arith.constant 0 : index
    %1 = vector.load %arg2[%c0_1, %c0_2] : memref<1x128xf32, #tpu.memory_space<vmem>>, vector<1x128xf32>
    %2 = vector.broadcast %1 : vector<1x128xf32> to vector<128x128xf32>
    %3 = arith.subf %0, %2 : vector<128x128xf32>
    %c0_3 = arith.constant 0 : index
    %c0_4 = arith.constant 0 : index
    %4 = vector.load %arg3[%c0_3, %c0_4] : memref<1x128xf32, #tpu.memory_space<vmem>>, vector<1x128xf32>
    %5 = vector.broadcast %4 : vector<1x128xf32> to vector<128x128xf32>
    %6 = arith.mulf %3, %5 : vector<128x128xf32>
    %c0_5 = arith.constant 0 : index
    %c0_6 = arith.constant 0 : index
    %7 = vector.load %arg4[%c0_5, %c0_6] : memref<128x128xf32, #tpu.memory_space<vmem>>, vector<128x128xf32>
    tpu.vector_store %arg4[%c0_5, %c0_6], %6 {strides = array<i32>} : memref<128x128xf32, #tpu.memory_space<vmem>>, vector<128x128xf32>,
    return
  }
  func.func @transform_0(%arg0: i32) -> (i32, i32) {
    %c0_i32 = arith.constant 0 : i32
    %c0_i32_0 = arith.constant 0 : i32
    return %arg0, %c0_i32 : i32, i32
  }
  func.func @transform_1(%arg0: i32) -> (i32, i32) {
    %c0_i32 = arith.constant 0 : i32
    %c0_i32_0 = arith.constant 0 : i32
    %c0_i32_1 = arith.constant 0 : i32
    return %c0_i32, %c0_i32_0 : i32, i32
  }
  func.func @transform_2(%arg0: i32) -> (i32, i32) {
    %c0_i32 = arith.constant 0 : i32
    %c0_i32_0 = arith.constant 0 : i32
    %c0_i32_1 = arith.constant 0 : i32
    return %c0_i32, %c0_i32_0 : i32, i32
  }
  func.func @transform_3(%arg0: i32) -> (i32, i32) {
    %c0_i32 = arith.constant 0 : i32
    %c0_i32_0 = arith.constant 0 : i32
    return %arg0, %c0_i32 : i32, i32
  }
}

</mosaic_0001>

<bundles_post_ra>
// kernel: tpu_custom_call.1
= control target key start
LH: loop header
LB: loop body
LE: loop exit
PB: predicated region body
PF: predicated region fallthrough
CT: control target
= control target key end

     0   :  { %8 = vsyncpa [#allocation3], 0  ;;  %s901_s0 = inlined_call_operand.hbm [shape: f32[300,128], index: 0, kind: input, shape index: {}]   ;;  %s902_s1 = inlined_call_operand.hbm [shape: f32[1,128], index: 1, kind: input, shape index: {}]   ;;  %s903_s2 = inlined_call_operand.vmem [shape: f32[1,128], index: 2, kind: input, shape index: {}]   ;;  %s904_s3 = inlined_call_operand.hbm [shape: f32[300,128], index: 3, kind: output, shape index: {}]  }
   0x1   :  { %10 = vsyncpa [#allocation3 + $0x1], 0 }
   0x2   :  { %11 = vsyncpa [#allocation6], 0 }
   0x3   :  { %12 = vsyncpa [#allocation4], 0 }
   0x4   :  { %14 = vsyncpa [#allocation4 + $0x1], 0  ;;  %s662_s12 = smov 0   ;;  %s664_s13 = smov 0  }
   0x5   :  { %s666_s14 = smov 0   ;;  %s668_s15 = smov 0  }
   0x6 LB: > { %s683_s16 = sadd.s32 4294967295, %s633_s15   ;;  %s401_s17 = sadd.s32 4294967294, %s633_s15   ;;  %s633_s15 = sphi %s668_s15, %s919_s15   ;;  %s629_s14 = sphi %s666_s14, %s918_s14   ;;  %s625_s13 = sphi %s664_s13, %s917_s13   ;;  %s621_s12 = sphi %s662_s12, %s916_s12  }
   0x7   : > { %s687_s18 = sadd.s32 1, %s633_s15   ;;  %s27_s19 = sadd.s32 1, %s629_s14 }
   0x8   : > { %s24_s20 = ssub.s32 %s633_s15, %s687_s18  ;;  %p34_p0 = scmp.ne.s32.totalorder %s629_s14, %s625_s13 }
   0x9   : > { %p25_p1 = scmp.eq.s32.totalorder %s24_s20, 0  ;;  %p35_p2 = scmp.eq.s32.totalorder %s633_s15, 0 }
   0xa   : > { %p40_p3 = scmp.ne.s32.totalorder %s625_s13, %s621_s12  ;;  %p905_p4 = scmp.eq.s32.totalorder %s683_s16, 0 }
   0xb   : > { %s699_s21 = scalar_select %p25_p1, %s629_s14, %s27_s19  }
   0xc   : > { %p701_p5 = por %p35_p2, %p34_p0  ;;  %p707_p6 = por %p905_p4, %p40_p3 }
   0xd   : > { %p106_p7 = scmp.eq.s32.totalorder %s683_s16, 2  ;;  %p112_p8 = scmp.eq.s32.totalorder %s401_s17, 2 }
   0xe   : > { %p402_p9 = scmp.ge.s32.totalorder %s633_s15, 1  ;;  %p119_p10 = scmp.lt.s32.totalorder %s633_s15, 4 }
   0xf   : > { %p714_p11 = por %p106_p7, %p34_p0  ;;  %p718_p12 = por %p112_p8, %p40_p3 }
  0x10   : > { %p722_p13 = pnand %p402_p9, %p119_p10  ;;  %s131_s29 = sshll.u32 %s902_s1, 4  ;;  %s132_s29 = int_to_ptr.hbm [resolvable:$true] %s131_s29 }
  0x11   : > { %s909_s25 = scalar_select %p718_p12, 1, 0 }
  0x12   : > { %p433_p1 = pneg %p722_p13  ;;  %s635_s30 = smov [#allocation5]  }
  0x13   : > { %s133_s4 = sshll.u32 %s635_s30, 4  ;;  %p404_p2 = scmp.ge.s32.totalorder %s633_s15, 3  ;;  %s134_s4 = int_to_ptr.vmem [resolvable:$true] %s133_s4 }
  0x14   : > { %p434_p0 = pnand %p433_p1, %p905_p4 }
  0x15   : > { %143 = sbr.rel (%p404_p2) target bundleno = 62 (0x3e), region = 24 }
  0x16   : > { %436 = dma.hbm_to_vmem [thread:$0]  (!%p434_p0), %s132_s29, 16, %s134_s4, [#allocation6]  }
  0x1a   : > { %146 = sbr.rel (!%p701_p5) target bundleno = 62 (0x3e), region = 28  ;;  %s147_s5 = sand.u32 (%p701_p5), 1, %s629_s14  }
  0x1b   : > { %s406_s6 = sshll.u32 (%p701_p5), %s633_s15, 4  ;;  %s405_s7 = sshll.u32 (%p701_p5), %s147_s5, 7 }
  0x1c   : > { %s153_s8 = ssub.s32 (%p701_p5), 38, %s406_s6  ;;  %s741_s17 = scalar_lea.sflag (%p701_p5), [#allocation3], %s147_s5 }
  0x1d   : > { %p154_p3 = scmp.lt.s32.totalorder (%p701_p5), %s153_s8, 16  ;;  %s151_s19 = scalar_lea.vmem (%p701_p5), [#allocation2], %s405_s7 }
  0x1f   : > { %s921_s8 = smov (!%p154_p3, %s153_s8), 16 }
  0x20   : > { %s407_s9 = sshll.u32 %s921_s8, 3 }
  0x21   : > { %s157_s10 = ssub.s32 128, %s407_s9 }
  0x22   : > { %s158_s11 = sshll.u32 %s157_s10, 4 }
  0x23   : > { %159 = vsyncadd %s741_s17, %s158_s11  ;;  %p744_p5 = scmp.ne.s32.totalorder %s407_s9, 0  ;;  %s425_s22 = sshll.u32 %s633_s15, 7 }
  0x24   : > { %s162_s29 = scalar_lea.hbm %s901_s0, %s425_s22  ;;  %s752_s30 = sshll.u32 %s151_s19, 4  ;;  %s167_s30 = int_to_ptr.vmem [resolvable:$true] %s752_s30 }
  0x25   : > { %s164_s4 = sshll.u32 %s162_s29, 4  ;;  %s411_s5 = sshll.u32 %s921_s8, 7  ;;  %s755_s4 = int_to_ptr.hbm [resolvable:$true] %s164_s4 }
  0x26   : > { %s513_s6 = sshra.s32 %s755_s4, 4  ;;  %s515_s7 = sshrl.u32 %s411_s5, 4  ;;  %s514_s6 = int_to_ptr.hbm [resolvable:$true] %s513_s6 }
  0x27   : > { %s520_s9 = scalar_lea.hbm %s514_s6, %s515_s7  ;;  %s524_s19 = scalar_lea.hbm %s901_s0, 304 }
  0x28   : > { %p521_p7 = scmp.ne.s32.totalorder %s514_s6, %s520_s9  ;;  %p525_p10 = scmp.lt.s32.totalorder %s514_s6, %s901_s0 }
  0x29   : > { %p526_p1 = scmp.lt.s32.totalorder %s524_s19, %s520_s9 }
  0x2a   : > { %p522_p8 = pnand %p521_p7, %p744_p5 }
  0x2b   : > { %p527_p0 = por %p526_p1, %p525_p10 }
  0x2c   : > { %p523_p9 = pneg %p522_p8 }
  0x2e   : > { %p528_p2 = pnand %p527_p0, %p523_p9 }
  0x30   : > { %531 = shalt.err (!%p528_p2)
}
  0x31   : > { %s532_s28 = sshra.s32 %s167_s30, 4  ;;  %s636_s10 = smov [#allocation2]   ;;  %s533_s28 = int_to_ptr.vmem [resolvable:$true] %s532_s28 }
  0x32   : > { %s539_s29 = scalar_lea.vmem %s533_s28, %s515_s7  ;;  %s543_s11 = scalar_lea.vmem %s636_s10, 256 }
  0x33   : > { %p540_p3 = scmp.ne.s32.totalorder %s533_s28, %s539_s29  ;;  %p545_p4 = scmp.lt.s32.totalorder %s543_s11, %s539_s29 }
  0x35   : > { %p541_p7 = pnand %p540_p3, %p744_p5 }
  0x37   : > { %p542_p8 = pneg %p541_p7 }
  0x39   : > { %p547_p12 = pnand %p545_p4, %p542_p8 }
  0x3b   : > { %550 = shalt.err (!%p547_p12)
}
  0x3c   : > { %s637_s6 = smov 128   ;;  %s638_s9 = smov 8  }
  0x3d   : > { %172 = dma.hbm_to_vmem [thread:$0]  (%p744_p5), %s755_s4, %s411_s5, %s167_s30, %s741_s17, %s637_s6, %s637_s6, %s638_s9  }
  0x3e PF: > { %178 = sbr.rel (%p722_p13) target bundleno = 124 (0x7c), region = 32  ;;  %s784_s7 = sand.u32 (!%p722_p13), 1, %s625_s13  }
  0x3f   : > { %s413_s19 = sshll.u32 (!%p722_p13), %s784_s7, 7  ;;  %s181_s22 = scalar_lea.sflag (!%p722_p13), [#allocation3], %s784_s7 }
  0x40   : > { %s790_s27 = scalar_lea.vmem (!%p722_p13), [#allocation2], %s413_s19 }
  0x43   : > { %608 = dma.done.wait (%p707_p6), %s181_s22, 2048  }
  0x44   : > { %610 = vsyncadd (%p707_p6), %s181_s22, 4294965248  ;;  %p912_p4 = scmp.eq.s32.totalorder %s683_s16, 0 }
  0x46   : > { %612 = dma.done.wait (%p912_p4), [#allocation6], 16   ;;  %p913_p12 = pmov %p912_p4 }
  0x47   : > { %v223_v0 = vld [vmem:[%s790_s27] sm:$0xff]  ;;  %v224_v3 = vld [vmem:[%s790_s27 + $0x8] sm:$0xff]  ;;  %v225_v6 = vld [vmem:[%s790_s27 + $0x10] sm:$0xff]  ;;  %s816_s23 = scalar_lea.vmem [#allocation7], %s413_s19  ;;  %s296_s17 = scalar_lea.sflag [#allocation4], %s784_s7 }
  0x48   : > { %614 = vsyncadd (%p913_p12), [#allocation6], 4294967280  ;;  %v481_v1 = vld [vmem:[#allocation5] ss:$0 sm:$0xff]  ;;  %v226_v7 = vld [vmem:[%s790_s27 + $0x18] sm:$0xff]  ;;  %s417_s20 = sshll.u32 (%p714_p11), %s683_s16, 4 }
  0x49   : > { %v482_v2 = vld [vmem:[%s903_s2] ss:$0 sm:$0xff]  ;;  %v243_v4 = vsub.f32 %v223_v0, %v481_v1  ;;  %v244_v5 = vsub.f32 %v224_v3, %v481_v1  ;;  %v245_v9 = vsub.f32 %v225_v6, %v481_v1  ;;  %v246_v10 = vsub.f32 %v226_v7, %v481_v1  ;;  %v228_v12 = vld [vmem:[%s790_s27 + $0x28] sm:$0xff]  ;;  %v229_v13 = vld [vmem:[%s790_s27 + $0x30] sm:$0xff]  ;;  %s304_s30 = ssub.s32 (%p714_p11), 38, %s417_s20 }
  0x4a   : > { %v227_v8 = vld [vmem:[%s790_s27 + $0x20] sm:$0xff]  ;;  %v230_v14 = vld [vmem:[%s790_s27 + $0x38] sm:$0xff]  ;;  %v248_v17 = vsub.f32 %v228_v12, %v481_v1  ;;  %v249_v18 = vsub.f32 %v229_v13, %v481_v1  ;;  %v232_v20 = vld [vmem:[%s790_s27 + $0x48] sm:$0xff]  ;;  %p305_p6 = scmp.lt.s32.totalorder (%p714_p11), %s304_s30, 16 }
  0x4b   : > { %v247_v11 = vsub.f32 %v227_v8, %v481_v1  ;;  %v263_v15 = vmul.f32 %v482_v2, %v243_v4  ;;  %v264_v16 = vmul.f32 %v482_v2, %v244_v5  ;;  %v231_v19 = vld [vmem:[%s790_s27 + $0x40] sm:$0xff]  ;;  %v265_v21 = vmul.f32 %v482_v2, %v245_v9  ;;  %v233_v24 = vld [vmem:[%s790_s27 + $0x50] sm:$0xff]  ;;  %v234_v27 = vld [vmem:[%s790_s27 + $0x58] sm:$0xff] }
  0x4c   : > { %v266_v22 = vmul.f32 %v482_v2, %v246_v10  ;;  %v250_v23 = vsub.f32 %v230_v14, %v481_v1  ;;  %v251_v26 = vsub.f32 %v231_v19, %v481_v1  ;;  %v268_v28 = vmul.f32 %v482_v2, %v248_v17  ;;  %v235_v30 = vld [vmem:[%s790_s27 + $0x60] sm:$0xff]  ;;  %v236_v33 = vld [vmem:[%s790_s27 + $0x68] sm:$0xff]  ;;  %v237_v36 = vld [vmem:[%s790_s27 + $0x70] sm:$0xff] }
  0x4d   : > { %279 = vst [vmem:[%s816_s23] sm:$0xff] %v263_v15  ;;  %v267_v25 = vmul.f32 %v482_v2, %v247_v11  ;;  %v252_v29 = vsub.f32 %v232_v20, %v481_v1  ;;  %v269_v31 = vmul.f32 %v482_v2, %v249_v18  ;;  %v253_v32 = vsub.f32 %v233_v24, %v481_v1  ;;  %v238_v39 = vld [vmem:[%s790_s27 + $0x78] sm:$0xff] }
  0x4e   : > { %280 = vst [vmem:[%s816_s23 + $0x8] sm:$0xff] %v264_v16  ;;  %v270_v34 = vmul.f32 %v482_v2, %v250_v23  ;;  %v254_v35 = vsub.f32 %v234_v27, %v481_v1  ;;  %v271_v37 = vmul.f32 %v482_v2, %v251_v26  ;;  %v255_v38 = vsub.f32 %v235_v30, %v481_v1 }
  0x4f   : > { %281 = vst [vmem:[%s816_s23 + $0x10] sm:$0xff] %v265_v21  ;;  %v272_v40 = vmul.f32 %v482_v2, %v252_v29  ;;  %v256_v41 = vsub.f32 %v236_v33, %v481_v1  ;;  %v273_v42 = vmul.f32 %v482_v2, %v253_v32  ;;  %v257_v43 = vsub.f32 %v237_v36, %v481_v1 }
  0x50   : > { %282 = vst [vmem:[%s816_s23 + $0x18] sm:$0xff] %v266_v22  ;;  %v274_v44 = vmul.f32 %v482_v2, %v254_v35  ;;  %v258_v45 = vsub.f32 %v238_v39, %v481_v1  ;;  %v275_v46 = vmul.f32 %v482_v2, %v255_v38 }
  0x51   : > { %283 = vst [vmem:[%s816_s23 + $0x20] sm:$0xff] %v267_v25  ;;  %v276_v47 = vmul.f32 %v482_v2, %v256_v41  ;;  %v277_v48 = vmul.f32 %v482_v2, %v257_v43 }
  0x52   : > { %284 = vst [vmem:[%s816_s23 + $0x28] sm:$0xff] %v268_v28  ;;  %v278_v49 = vmul.f32 %v482_v2, %v258_v45 }
  0x53   : > { %285 = vst [vmem:[%s816_s23 + $0x30] sm:$0xff] %v269_v31 }
  0x54   : > { %286 = vst [vmem:[%s816_s23 + $0x38] sm:$0xff] %v270_v34 }
  0x55   : > { %287 = vst [vmem:[%s816_s23 + $0x40] sm:$0xff] %v271_v37 }
  0x56   : > { %288 = vst [vmem:[%s816_s23 + $0x48] sm:$0xff] %v272_v40 }
  0x57   : > { %289 = vst [vmem:[%s816_s23 + $0x50] sm:$0xff] %v273_v42 }
  0x58   : > { %290 = vst [vmem:[%s816_s23 + $0x58] sm:$0xff] %v274_v44  ;;  %302 = sbr.rel (!%p714_p11) target bundleno = 124 (0x7c), region = 44 }
  0x59   : > { %291 = vst [vmem:[%s816_s23 + $0x60] sm:$0xff] %v275_v46 }
  0x5a   : > { %292 = vst [vmem:[%s816_s23 + $0x68] sm:$0xff] %v276_v47 }
  0x5b   : > { %293 = vst [vmem:[%s816_s23 + $0x70] sm:$0xff] %v277_v48 }
  0x5c   : > { %294 = vst [vmem:[%s816_s23 + $0x78] sm:$0xff] %v278_v49 }
  0x5d   : > { %s923_s30 = smov (!%p305_p6, %s304_s30), 16 }
  0x5e   : > { %s418_s4 = sshll.u32 %s923_s30, 3 }
  0x5f   : > { %s308_s5 = ssub.s32 128, %s418_s4 }
  0x60   : > { %s309_s28 = sshll.u32 %s308_s5, 4 }
  0x61   : > { %310 = vsyncadd %s296_s17, %s309_s28  ;;  %p848_p13 = scmp.ne.s32.totalorder %s418_s4, 0  ;;  %s426_s29 = sshll.u32 %s683_s16, 7 }
  0x62   : > { %s313_s6 = scalar_lea.hbm %s904_s3, %s426_s29  ;;  %s315_s9 = sshll.u32 %s816_s23, 4  ;;  %s857_s9 = int_to_ptr.vmem [resolvable:$true] %s315_s9 }
  0x63   : > { %s317_s19 = sshll.u32 %s313_s6, 4  ;;  %s422_s22 = sshll.u32 %s923_s30, 7  ;;  %s859_s19 = int_to_ptr.hbm [resolvable:$true] %s317_s19 }
  0x64   : > { %s552_s27 = sshra.s32 %s857_s9, 4  ;;  %s554_s26 = sshrl.u32 %s422_s22, 4  ;;  %s553_s27 = int_to_ptr.vmem [resolvable:$true] %s552_s27 }
  0x65   : > { %s559_s8 = scalar_lea.vmem %s553_s27, %s554_s26  ;;  %s639_s16 = smov [#allocation7]  }
  0x66   : > { %p560_p11 = scmp.ne.s32.totalorder %s553_s27, %s559_s8  ;;  %s563_s20 = scalar_lea.vmem %s639_s16, 256 }
  0x67   : > { %p565_p10 = scmp.lt.s32.totalorder %s563_s20, %s559_s8 }
  0x68   : > { %p561_p5 = pnand %p560_p11, %p848_p13 }
  0x6a   : > { %p562_p9 = pneg %p561_p5 }
  0x6c   : > { %p567_p1 = pnand %p565_p10, %p562_p9 }
  0x6e   : > { %570 = shalt.err (!%p567_p1)
}
  0x6f   : > { %s571_s23 = sshra.s32 %s859_s19, 4  ;;  %s582_s29 = scalar_lea.hbm %s904_s3, 304  ;;  %s572_s23 = int_to_ptr.hbm [resolvable:$true] %s571_s23 }
  0x70   : > { %s578_s4 = scalar_lea.hbm %s572_s23, %s554_s26  ;;  %p583_p7 = scmp.lt.s32.totalorder %s572_s23, %s904_s3 }
  0x71   : > { %p579_p0 = scmp.ne.s32.totalorder %s572_s23, %s578_s4  ;;  %p584_p8 = scmp.lt.s32.totalorder %s582_s29, %s578_s4 }
  0x73   : > { %p580_p2 = pnand %p579_p0, %p848_p13  ;;  %p585_p4 = por %p584_p8, %p583_p7 }
  0x75   : > { %p581_p3 = pneg %p580_p2 }
  0x77   : > { %p586_p12 = pnand %p585_p4, %p581_p3 }
  0x79   : > { %589 = shalt.err (!%p586_p12)
}
  0x7a   : > { %s640_s6 = smov 128   ;;  %s641_s27 = smov 8  }
  0x7b   : > { %323 = dma.vmem_to_hbm [thread:$0]  (%p848_p13), %s857_s9, %s422_s22, %s859_s19, %s296_s17, %s640_s6, %s640_s6, %s641_s27  }
  0x7c PF: > { %p443_p6 = scmp.ge.s32.totalorder %s633_s15, 2  ;;  %s332_s26 = sand.u32 1, %s621_s12  }
  0x7d   : > { %p915_p11 = scmp.ne.s32.totalorder %s909_s25, 0  ;;  %s333_s8 = scalar_lea.sflag [#allocation4], %s332_s26 }
  0x7f   : > { %p438_p5 = pnand %p443_p6, %p915_p11 }
  0x81   : > { %p439_p9 = pneg %p438_p5 }
  0x83   : > { %616 = dma.done.wait (%p439_p9), %s333_s8, 2048  }
  0x84   : > { %618 = vsyncadd (%p439_p9), %s333_s8, 4294965248  ;;  %p17_p10 = scmp.ge.s32.totalorder %s687_s18, 5   ;;  %s916_s12 = smov %s625_s13 }
  0x85   : > { %s917_s13 = smov %s629_s14  ;;  %s918_s14 = smov %s699_s21 }
  0x86   : > { %s919_s15 = smov %s687_s18  ;;  %19 = sbr.rel (!%p17_p10) target bundleno = 6 (0x6), region = 81 }
  0x8b   :  { %339 = vsyncpa [#allocation3], 1 }
  0x8c   :  { %341 = vsyncpa [#allocation3 + $0x1], 1 }
  0x8d   :  { %342 = vsyncpa [#allocation6], 1 }
  0x8e   :  { %343 = vsyncpa [#allocation4], 1 }
  0x8f   :  { %345 = vsyncpa [#allocation4 + $0x1], 1 }

</bundles_post_ra>
